<compile_context>
chip_gen: v7x
topology: tpu7x:2x2x1
jax: 0.10.0
libtpu: 0.0.40
codegen_flags: <defaults>
</compile_context>

<pallas_src>
import functools

import jax
import jax.numpy as jnp
from jax.experimental import pallas as pl
from jax.experimental.pallas import tpu as pltpu

IN_FEATURES = 64      # 8 * 8
OUT_FEATURES = 10
N_PAD = 128           # lane-dense padded output width


def _round_up(x, m):
    return ((x + m - 1) // m) * m


def _linear_kernel(x_ref, wt_ref, b_ref, o_ref):
    # x_ref:  (TILE_B, 64)  bf16
    # wt_ref: (64, 128)     bf16 (zero-padded beyond column 10)
    # b_ref:  (1, 128)      f32  (zero-padded beyond column 10)
    # o_ref:  (TILE_B, 128) f32
    acc = jnp.dot(x_ref[...], wt_ref[...], preferred_element_type=jnp.float32)
    o_ref[...] = acc + b_ref[...]          # f32 elementwise (v5e-safe)


@functools.partial(jax.jit, static_argnames=("tile_b", "force_pallas"))
def mlp_s_forward(x, weight, bias, *, tile_b=512, force_pallas=False):
    """x: (B, 8, 8) or (B, 64). weight: (10, 64). bias: (10,). Returns (B, 10) f32."""
    B = x.shape[0]
    x2 = x.reshape(B, IN_FEATURES)                       # flatten(start_dim=1)

    # Fast path: at tiny batch the pallas_call launch/DMA setup dwarfs ~1.3K FLOPs.
    if B < 256 and not force_pallas:
        return (x2.astype(jnp.float32) @ weight.T.astype(jnp.float32)
                + bias.astype(jnp.float32))

    # ---- Pallas path ----
    # Tile/pad the batch so block shapes satisfy the (8, 128) rule.
    tile_b_eff = min(tile_b, _round_up(B, 8))
    tile_b_eff = _round_up(tile_b_eff, 8)
    B_pad = _round_up(B, tile_b_eff)
    n_tiles = B_pad // tile_b_eff

    # bf16 activation / weight stream (halves HBM traffic; kernel is mem-bound).
    x_p = jnp.pad(x2.astype(jnp.bfloat16), ((0, B_pad - B), (0, 0)))
    wt_p = jnp.zeros((IN_FEATURES, N_PAD), jnp.bfloat16)
    wt_p = wt_p.at[:, :OUT_FEATURES].set(weight.T.astype(jnp.bfloat16))
    b_p = jnp.zeros((1, N_PAD), jnp.float32)
    b_p = b_p.at[:, :OUT_FEATURES].set(bias.astype(jnp.float32))

    cost = pl.CostEstimate(
        flops=2 * B_pad * IN_FEATURES * N_PAD,
        transcendentals=0,
        bytes_accessed=(x_p.size * 2 + wt_p.size * 2 + b_p.size * 4
                        + B_pad * N_PAD * 4),
    )

    out_pad = pl.pallas_call(
        _linear_kernel,
        out_shape=jax.ShapeDtypeStruct((B_pad, N_PAD), jnp.float32),
        grid=(n_tiles,),
        in_specs=[
            pl.BlockSpec((tile_b_eff, IN_FEATURES), lambda i: (i, 0)),
            pl.BlockSpec((IN_FEATURES, N_PAD), lambda i: (0, 0)),
            pl.BlockSpec((1, N_PAD), lambda i: (0, 0)),
        ],
        out_specs=pl.BlockSpec((tile_b_eff, N_PAD), lambda i: (i, 0)),
        compiler_params=pltpu.CompilerParams(
            dimension_semantics=("parallel",),
        ),
        cost_estimate=cost,
    )(x_p, wt_p, b_p)

    return out_pad[:B, :OUT_FEATURES]


def init_params(key):
    # Mimic nn.Linear default init: U(-1/sqrt(in_features), +1/sqrt(in_features))
    k_w, k_b = jax.random.split(key)
    bound = 1.0 / jnp.sqrt(float(IN_FEATURES))
    weight = jax.random.uniform(
        k_w, (OUT_FEATURES, IN_FEATURES), jnp.float32, -bound, bound
    )
    bias = jax.random.uniform(k_b, (OUT_FEATURES,), jnp.float32, -bound, bound)
    return weight, bias


if __name__ == "__main__":
    key = jax.random.PRNGKey(0)
    k_x, k_x2, k_p = jax.random.split(key, 3)

    weight, bias = init_params(k_p)

    # Small shape consistent with the module (batch=2, 8x8 image) — force the
    # Pallas path so the kernel itself is exercised at least once.
    B = 2
    x_small = jax.random.normal(k_x, (B, 8, 8), jnp.float32)
    out_small = jax.block_until_ready(
        mlp_s_forward(x_small, weight, bias, force_pallas=True)
    )
    ref_small = x_small.reshape(B, -1) @ weight.T + bias
    assert out_small.shape == (B, OUT_FEATURES)
    assert jnp.allclose(out_small, ref_small, rtol=2e-2, atol=2e-2), \
        "mismatch vs reference (small batch)"

    # Larger, non-multiple-of-tile batch to exercise multi-tile grid + padding.
    B2 = 1040
    x_big = jax.random.normal(k_x2, (B2, 8, 8), jnp.float32)
    out_big = jax.block_until_ready(mlp_s_forward(x_big, weight, bias))
    ref_big = x_big.reshape(B2, -1) @ weight.T + bias
    assert out_big.shape == (B2, OUT_FEATURES)
    assert jnp.allclose(out_big, ref_big, rtol=2e-2, atol=2e-2), \
        "mismatch vs reference (large batch)"

    print("KERNEL_OK")
</pallas_src>

<mosaic_0001>
module attributes {stable_mosaic.version = 11 : i64} {
  func.func @_linear_kernel(%arg0: i32, %arg1: memref<8x64xbf16, #tpu.memory_space<vmem>>, %arg2: memref<64x128xbf16, #tpu.memory_space<vmem>>, %arg3: memref<1x128xf32, #tpu.memory_space<vmem>>, %arg4: memref<8x128xf32, #tpu.memory_space<vmem>>) attributes {dimension_semantics = [#tpu.dimension_semantics<parallel>], iteration_bounds = array<i64: 1>, scalar_prefetch = 0 : i64, scratch_operands = 0 : i64, tpu.core_type = #tpu.core_type<tc>, window_params = [{transform_indices = @transform_0, window_bounds = array<i64: 8, 64>}, {pipeline_mode = #tpu.pipeline_mode<synchronous>, transform_indices = @transform_1, window_bounds = array<i64: 64, 128>}, {pipeline_mode = #tpu.pipeline_mode<synchronous>, transform_indices = @transform_2, window_bounds = array<i64: 1, 128>}, {transform_indices = @transform_3, window_bounds = array<i64: 8, 128>}]} {
    %c0 = arith.constant 0 : index
    %c0_0 = arith.constant 0 : index
    %0 = vector.load %arg1[%c0, %c0_0] : memref<8x64xbf16, #tpu.memory_space<vmem>>, vector<8x64xbf16>
    %c0_1 = arith.constant 0 : index
    %c0_2 = arith.constant 0 : index
    %1 = vector.load %arg2[%c0_1, %c0_2] : memref<64x128xbf16, #tpu.memory_space<vmem>>, vector<64x128xbf16>
    %cst = arith.constant dense<0.000000e+00> : vector<8x128xf32>
    %2 = tpu.matmul %0, %1, %cst {dimension_numbers = #tpu.dot_dimension_numbers<[1], [0], [0], [1], [0, 0, 1, 1], [], []>} : vector<8x64xbf16>, vector<64x128xbf16>, vector<8x128xf32> -> vector<8x128xf32>
    %c0_3 = arith.constant 0 : index
    %c0_4 = arith.constant 0 : index
    %3 = vector.load %arg3[%c0_3, %c0_4] : memref<1x128xf32, #tpu.memory_space<vmem>>, vector<1x128xf32>
    %4 = vector.broadcast %3 : vector<1x128xf32> to vector<8x128xf32>
    %5 = arith.addf %2, %4 : vector<8x128xf32>
    %c0_5 = arith.constant 0 : index
    %c0_6 = arith.constant 0 : index
    %6 = vector.load %arg4[%c0_5, %c0_6] : memref<8x128xf32, #tpu.memory_space<vmem>>, vector<8x128xf32>
    tpu.vector_store %arg4[%c0_5, %c0_6], %5 {strides = array<i32>} : memref<8x128xf32, #tpu.memory_space<vmem>>, vector<8x128xf32>,
    return
  }
  func.func @transform_0(%arg0: i32) -> (i32, i32) {
    %c0_i32 = arith.constant 0 : i32
    %c0_i32_0 = arith.constant 0 : i32
    return %arg0, %c0_i32 : i32, i32
  }
  func.func @transform_1(%arg0: i32) -> (i32, i32) {
    %c0_i32 = arith.constant 0 : i32
    %c0_i32_0 = arith.constant 0 : i32
    %c0_i32_1 = arith.constant 0 : i32
    return %c0_i32, %c0_i32_0 : i32, i32
  }
  func.func @transform_2(%arg0: i32) -> (i32, i32) {
    %c0_i32 = arith.constant 0 : i32
    %c0_i32_0 = arith.constant 0 : i32
    %c0_i32_1 = arith.constant 0 : i32
    return %c0_i32, %c0_i32_0 : i32, i32
  }
  func.func @transform_3(%arg0: i32) -> (i32, i32) {
    %c0_i32 = arith.constant 0 : i32
    %c0_i32_0 = arith.constant 0 : i32
    return %arg0, %c0_i32 : i32, i32
  }
}

</mosaic_0001>

<bundles_post_ra>
// kernel: mlp_s_forward.1
= control target key start
LH: loop header
LB: loop body
LE: loop exit
PB: predicated region body
PF: predicated region fallthrough
CT: control target
= control target key end

     0   :  { %v133_v0 = vmov 0.0   ;;  %vm134_vm0 = vmmov 0   ;;  %vm55_vm1 = vcmask 523264   ;;  %s176_s1 = inlined_call_operand.vmem [shape: bf16[64,128], index: 1, kind: input, shape index: {}]   ;;  %s177_s0 = inlined_call_operand.vmem [shape: bf16[8,64], index: 0, kind: input, shape index: {}]   ;;  %s178_s2 = inlined_call_operand.vmem [shape: f32[1,128], index: 2, kind: input, shape index: {}]   ;;  %s179_s3 = inlined_call_operand.vmem [shape: f32[8,128], index: 3, kind: output, shape index: {}]  }
   0x1   :  { %115 = vmatprep.subr.bf16.mxu0 %v133_v0  ;;  %v129_v1 = vld [vmem:[%s176_s1] sm:$0xff]   ;;  %123 = vmatprep.mubr.msk.bf16.mxu0 %vm134_vm0, %v133_v0  ;;  %v130_v2 = vld [vmem:[%s176_s1 + $0x8] sm:$0xff]   ;;  %v131_v3 = vld [vmem:[%s176_s1 + $0x10] sm:$0xff]  }
   0x2   :  { %116 = vmatpush3.bf16.msra.mxu0 %v129_v1  ;;  %v132_v4 = vld [vmem:[%s176_s1 + $0x18] sm:$0xff]   ;;  %v15_v5 = vld [vmem:[%s177_s0] sm:$0xf] }
   0x3   :  { %117 = vmatprep.subr.bf16.mxu0 %v133_v0  ;;  %v104_v6 = vld [vmem:[%s178_s2] ss:$0 sm:$0xff] }
   0x6   :  { %118 = vmatpush3.bf16.msra.mxu0 %v130_v2 }
   0x7   :  { %119 = vmatprep.subr.bf16.mxu0 %v133_v0 }
   0xa   :  { %120 = vmatpush3.bf16.msra.mxu0 %v131_v3 }
   0xb   :  { %121 = vmatprep.subr.bf16.mxu0 %v133_v0 }
   0xe   :  { %122 = vmatpush3.bf16.msra.mxu0 %v132_v4 }
  0x11   :  { %124 = vmatmul.mubr.msk.bf16.vlgmr.msra.gmra.mrb[0].mxu0 %vm55_vm1, %v15_v5 }
  0xe4   :  { %v93_v7 = vpop.f32.mrb[0].mxu0 }
  0xe5   :  { %v94_v8 = vadd.f32 %v104_v6, %v93_v7  ;;  %v125_v9 = vpop.f32.mrb[1].mxu0 }
  0xe6   :  { %v96_v10 = vpop.f32.mrb[2].mxu0 }
  0xe7   :  { %99 = vst [vmem:[%s179_s3] sm:$0xff] %v94_v8  ;;  %v126_v11 = vpop.f32.mrb[3].mxu0 }

</bundles_post_ra>
